<compile_context>
chip_gen: v7x
topology: tpu7x:2x2x1
jax: 0.10.0
libtpu: 0.0.40
codegen_flags: <defaults>
</compile_context>

<pallas_src>
import functools

import jax
import jax.numpy as jnp
from jax import lax
from jax.experimental import pallas as pl
from jax.experimental.pallas import tpu as pltpu


def _abs_pow(x, p):
    """|x| ** p, lowered to cheap VPU multiplies for small integer p."""
    if p == 1:
        return jnp.abs(x)
    if p == 2:
        return x * x                      # |x|^2 == x*x: skip the abs
    if p == 3:
        return jnp.abs(x) * x * x
    if p == 4:
        sq = x * x
        return sq * sq
    if isinstance(p, int) and p > 0:
        # exponentiation by squaring on |x| -> still multiplies only
        base = jnp.abs(x)
        result = None
        e = p
        while e:
            if e & 1:
                result = base if result is None else result * base
            e >>= 1
            if e:
                base = base * base
        return result
    # genuinely fractional p -> generic pow (exp/log on the EUP)
    return jnp.abs(x) ** p


def _at_kernel(s_ref, t_ref, out_ref, ams_ref, amt_ref, *,
               p, eps, c_total, tc, use_mxu_reduce):
    """Grid = (batch tiles, channel chunks); channel axis is the reduction.

    s_ref, t_ref   : (TB, TC, HW) feature-map chunks (student / teacher).
    out_ref        : (1, 1, 128) per-batch-tile partial sum of squared diffs
                     (value broadcast across lanes; wrapper reads lane 0).
    ams_ref/amt_ref: (TB, HW) f32 attention-map accumulators (VMEM scratch).
    """
    c = pl.program_id(1)

    @pl.when(c == 0)
    def _():
        ams_ref[...] = jnp.zeros_like(ams_ref)
        amt_ref[...] = jnp.zeros_like(amt_ref)

    s = s_ref[...]
    t = t_ref[...]

    if (c_total % tc) != 0:
        # Last channel chunk extends past C: zero the undefined padded
        # channels BEFORE |x|^p so they contribute nothing (and no NaNs).
        ch = lax.broadcasted_iota(jnp.int32, s.shape, 1)
        valid = ch < (c_total - c * tc)
        s = jnp.where(valid, s, jnp.zeros_like(s))
        t = jnp.where(valid, t, jnp.zeros_like(t))

    if use_mxu_reduce:
        # bf16, p == 2: square in bf16 and do the channel (sublane) reduction
        # as a ones-row matmul on the otherwise idle MXU, accumulating in f32.
        ps = s * s
        pt = t * t
        ones = jnp.ones((1, tc), dtype=ps.dtype)
        tb = ps.shape[0]
        sum_s = jnp.concatenate(
            [jnp.dot(ones, ps[b], preferred_element_type=jnp.float32)
             for b in range(tb)], axis=0)                       # (TB, HW) f32
        sum_t = jnp.concatenate(
            [jnp.dot(ones, pt[b], preferred_element_type=jnp.float32)
             for b in range(tb)], axis=0)
    else:
        # Per-chunk upcast keeps the f32 working set bounded to one chunk.
        sf = s.astype(jnp.float32)
        tf = t.astype(jnp.float32)
        ps = _abs_pow(sf, p)
        pt = _abs_pow(tf, p)
        sum_s = jnp.sum(ps, axis=1)                             # (TB, HW)
        sum_t = jnp.sum(pt, axis=1)

    # am += sum_c |fm|^p
    ams_ref[...] += sum_s
    amt_ref[...] += sum_t

    @pl.when(c == pl.num_programs(1) - 1)
    def _():
        am_s = ams_ref[...]
        am_t = amt_ref[...]
        # Frobenius norm over the spatial map (torch.norm(am, dim=(2, 3))).
        norm_s = jnp.sqrt(jnp.sum(am_s * am_s, axis=1, keepdims=True))  # (TB,1)
        norm_t = jnp.sqrt(jnp.sum(am_t * am_t, axis=1, keepdims=True))
        # One reciprocal per image, then a broadcast multiply (no vector div).
        inv_s = 1.0 / (norm_s + eps)
        inv_t = 1.0 / (norm_t + eps)
        diff = am_s * inv_s - am_t * inv_t
        partial = jnp.sum(diff * diff)  # 0-d f32 partial MSE numerator
        out_ref[...] = jnp.broadcast_to(partial, out_ref.shape)


def _pick_tb(B, max_tb):
    """Largest TB <= max_tb dividing B, preferring an even number of tiles."""
    best, best_even = 1, None
    for tb in range(1, min(B, max(1, max_tb)) + 1):
        if B % tb == 0:
            best = tb
            if (B // tb) % 2 == 0:
                best_even = tb
    return best_even if best_even is not None else best


def at_loss(fm_s, fm_t, p=2.0, eps=1e-6):
    """AT.forward(fm_s, fm_t): fm_* are NCHW feature maps of identical shape."""
    assert fm_s.shape == fm_t.shape
    B, C, H, W = fm_s.shape
    HW = H * W

    # Integer exponents lower to cheap repeated multiplies on the VPU.
    if float(p).is_integer():
        p = int(p)

    # HW -> lanes, channels -> sublanes (free reshape from contiguous NCHW).
    # TODO(synk): for lane-sparse spatial maps (e.g. 7x7=49) with C >= 128 a
    # (B, HW, C) lane-dense layout + lane reduction would be denser, but the
    # required transpose is only worth it if it fuses upstream.
    s = fm_s.reshape(B, C, HW)
    t = fm_t.reshape(B, C, HW)

    itemsize = jnp.dtype(fm_s.dtype).itemsize

    # VMEM-derived per-input block budget (~4-8 MiB): big enough to amortize
    # the ~0.35 us per-grid-step overhead against the HBM-bound DMA, sized so
    # (2 inputs x 2 pipeline buffers) + 4 live f32 per-chunk temporaries fit
    # under ~75% of physical VMEM (64 MiB v7x, 128 MiB v5e/v6e).
    try:
        phys_vmem = int(pltpu.get_tpu_info().vmem_capacity_bytes)
    except Exception:
        phys_vmem = 64 << 20  # conservative fallback: v7x per-TensorCore VMEM
    usable_vmem = min(phys_vmem * 3 // 4, 96 << 20)
    per_block_factor = 4.0 + 4.0 * (4.0 / itemsize)
    budget_bytes = max(1 << 20, int(min(8 << 20, usable_vmem / per_block_factor)))
    budget_elems = budget_bytes // itemsize

    # Sublane packing of the channel (second-to-last) axis for this dtype:
    # 8 for f32, 16 for bf16, 32 for int8/fp8.
    pack = max(8, 32 // itemsize)

    if C * HW <= budget_elems:
        # Whole channel axis per step; pack several images per step, but keep
        # at least 2 batch tiles so the "parallel" batch axis can shard across
        # both TensorCores on v7x megacore (prefer an even tile count).
        TC = C
        max_tb = max(1, budget_elems // (C * HW))
        if B >= 2:
            max_tb = min(max_tb, B // 2)
        TB = _pick_tb(B, max_tb)
    else:
        # One image per step; chunk the channel (reduction) axis.
        # TODO(synk): also chunk HW for pathologically large spatial maps
        # where even a pack-sized channel chunk exceeds the budget.
        TB = 1
        max_tc = max(pack, (budget_elems // HW) // pack * pack)
        TC = 0
        for cand in range(min(max_tc, C), 0, -1):
            if C % cand == 0 and cand % pack == 0:
                TC = cand
                break
        if TC == 0:
            # No packing-aligned divisor of C fits the budget: take the
            # largest aligned chunk and mask the tail channels in-kernel.
            TC = max_tc if max_tc < C else C

    nb = B // TB                 # TB divides B by construction
    nc = pl.cdiv(C, TC)          # last chunk may be a masked partial chunk

    use_mxu_reduce = bool(
        p == 2 and s.dtype == jnp.bfloat16 and TC % pack == 0)

    # VMEM accounting: double-buffered inputs + (up to 4 live) f32 per-chunk
    # temporaries + attention-map accumulators + headroom.
    block_elems = TB * TC * HW
    block_bytes = block_elems * itemsize
    f32_tmp_bytes = 4 * block_elems * 4
    vmem_need = 4 * block_bytes + f32_tmp_bytes + 2 * TB * HW * 4 + (1 << 20)
    vmem_cap = max(16 << 20, phys_vmem - (4 << 20))
    vmem_limit = int(min(max(vmem_need, 16 << 20), vmem_cap))

    kernel = functools.partial(
        _at_kernel, p=p, eps=eps, c_total=C, tc=TC,
        use_mxu_reduce=use_mxu_reduce)

    flops = 4 * B * C * HW + 12 * B * HW
    transcendentals = (0 if isinstance(p, int) else 2 * B * C * HW) + 2 * B
    bytes_accessed = 2 * B * C * HW * itemsize + nb * 128 * 4

    partials = pl.pallas_call(
        kernel,
        out_shape=jax.ShapeDtypeStruct((nb, 1, 128), jnp.float32),
        grid_spec=pltpu.PrefetchScalarGridSpec(
            num_scalar_prefetch=0,
            grid=(nb, nc),
            in_specs=[
                pl.BlockSpec((TB, TC, HW), lambda b, c: (b, c, 0)),
                pl.BlockSpec((TB, TC, HW), lambda b, c: (b, c, 0)),
            ],
            # One independent output block per batch tile -> batch axis can
            # run "parallel" (both TensorCores on v7x); written once per tile.
            out_specs=pl.BlockSpec((1, 1, 128), lambda b, c: (b, 0, 0)),
            scratch_shapes=[
                pltpu.VMEM((TB, HW), jnp.float32),
                pltpu.VMEM((TB, HW), jnp.float32),
            ],
        ),
        compiler_params=pltpu.CompilerParams(
            dimension_semantics=("parallel", "arbitrary"),
            vmem_limit_bytes=vmem_limit,
        ),
        cost_estimate=pl.CostEstimate(
            flops=flops,
            transcendentals=transcendentals,
            bytes_accessed=bytes_accessed,
        ),
    )(s, t)

    # F.mse_loss default reduction='mean' over B*1*H*W elements.
    return jnp.sum(partials[:, 0, 0]) * jnp.float32(1.0 / (B * HW))


def _at_loss_ref(fm_s, fm_t, p=2.0, eps=1e-6):
    """Pure-JAX reference mirroring the PyTorch module."""
    def attention_map(fm):
        am = jnp.sum(jnp.abs(fm) ** p, axis=1, keepdims=True)          # (B,1,H,W)
        norm = jnp.sqrt(jnp.sum(am * am, axis=(2, 3), keepdims=True))  # (B,1,1,1)
        return am / (norm + eps)

    a_s = attention_map(fm_s)
    a_t = attention_map(fm_t)
    return jnp.mean((a_s - a_t) ** 2)


if __name__ == "__main__":
    key = jax.random.PRNGKey(0)
    k1, k2 = jax.random.split(key)

    B, C, H, W = 2, 4, 16, 16
    fm_s = jax.random.normal(k1, (B, C, H, W), dtype=jnp.float32)
    fm_t = jax.random.normal(k2, (B, C, H, W), dtype=jnp.float32)

    p = 2.0  # AT(p=2) is the standard setting in the paper

    loss = at_loss(fm_s, fm_t, p=p)
    jax.block_until_ready(loss)

    ref = _at_loss_ref(fm_s, fm_t, p=p)
    assert jnp.allclose(loss, ref, rtol=1e-5, atol=1e-6), (loss, ref)

    print("KERNEL_OK")
</pallas_src>

<mosaic_0001>
module attributes {stable_mosaic.version = 11 : i64} {
  func.func @_at_kernel(%arg0: i32, %arg1: i32, %arg2: memref<1x4x256xf32, #tpu.memory_space<vmem>>, %arg3: memref<1x4x256xf32, #tpu.memory_space<vmem>>, %arg4: memref<1x1x128xf32, #tpu.memory_space<vmem>>, %arg5: memref<1x256xf32, #tpu.memory_space<vmem>>, %arg6: memref<1x256xf32, #tpu.memory_space<vmem>>) attributes {dimension_semantics = [#tpu.dimension_semantics<parallel>, #tpu.dimension_semantics<arbitrary>], iteration_bounds = array<i64: 2, 1>, scalar_prefetch = 0 : i64, scratch_operands = 2 : i64, tpu.core_type = #tpu.core_type<tc>, window_params = [{transform_indices = @transform_0, window_bounds = array<i64: 1, 4, 256>}, {transform_indices = @transform_1, window_bounds = array<i64: 1, 4, 256>}, {transform_indices = @transform_2, window_bounds = array<i64: 1, 1, 128>}]} {
    %c0_i32 = arith.constant 0 : i32
    %0 = arith.cmpi eq, %arg1, %c0_i32 : i32
    %1 = arith.extui %0 : i1 to i32
    %c0_i32_0 = arith.constant 0 : i32
    %2 = arith.cmpi ne, %1, %c0_i32_0 : i32
    scf.if %2 {
      %cst_17 = arith.constant 0.000000e+00 : f32
      %18 = vector.broadcast %cst_17 : f32 to vector<1x256xf32>
      %c0_18 = arith.constant 0 : index
      %c0_19 = arith.constant 0 : index
      %19 = vector.load %arg5[%c0_18, %c0_19] : memref<1x256xf32, #tpu.memory_space<vmem>>, vector<1x256xf32>
      tpu.vector_store %arg5[%c0_18, %c0_19], %18 {strides = array<i32>} : memref<1x256xf32, #tpu.memory_space<vmem>>, vector<1x256xf32>,
      %cst_20 = arith.constant 0.000000e+00 : f32
      %20 = vector.broadcast %cst_20 : f32 to vector<1x256xf32>
      %c0_21 = arith.constant 0 : index
      %c0_22 = arith.constant 0 : index
      %21 = vector.load %arg6[%c0_21, %c0_22] : memref<1x256xf32, #tpu.memory_space<vmem>>, vector<1x256xf32>
      tpu.vector_store %arg6[%c0_21, %c0_22], %20 {strides = array<i32>} : memref<1x256xf32, #tpu.memory_space<vmem>>, vector<1x256xf32>,
    } else {
    }
    %c0 = arith.constant 0 : index
    %c0_1 = arith.constant 0 : index
    %c0_2 = arith.constant 0 : index
    %3 = vector.load %arg2[%c0, %c0_1, %c0_2] : memref<1x4x256xf32, #tpu.memory_space<vmem>>, vector<1x4x256xf32>
    %c0_3 = arith.constant 0 : index
    %c0_4 = arith.constant 0 : index
    %c0_5 = arith.constant 0 : index
    %4 = vector.load %arg3[%c0_3, %c0_4, %c0_5] : memref<1x4x256xf32, #tpu.memory_space<vmem>>, vector<1x4x256xf32>
    %5 = arith.mulf %3, %3 : vector<1x4x256xf32>
    %6 = arith.mulf %4, %4 : vector<1x4x256xf32>
    %cst = arith.constant dense<0.000000e+00> : vector<1x256xf32>
    %7 = vector.multi_reduction <add>, %5, %cst [1] : vector<1x4x256xf32> to vector<1x256xf32>
    %cst_6 = arith.constant dense<0.000000e+00> : vector<1x256xf32>
    %8 = vector.multi_reduction <add>, %6, %cst_6 [1] : vector<1x4x256xf32> to vector<1x256xf32>
    %c0_7 = arith.constant 0 : index
    %c0_8 = arith.constant 0 : index
    %9 = vector.load %arg5[%c0_7, %c0_8] : memref<1x256xf32, #tpu.memory_space<vmem>>, vector<1x256xf32>
    %10 = arith.addf %9, %7 : vector<1x256xf32>
    %c0_9 = arith.constant 0 : index
    %c0_10 = arith.constant 0 : index
    %11 = vector.load %arg5[%c0_9, %c0_10] : memref<1x256xf32, #tpu.memory_space<vmem>>, vector<1x256xf32>
    tpu.vector_store %arg5[%c0_9, %c0_10], %10 {strides = array<i32>} : memref<1x256xf32, #tpu.memory_space<vmem>>, vector<1x256xf32>,
    %c0_11 = arith.constant 0 : index
    %c0_12 = arith.constant 0 : index
    %12 = vector.load %arg6[%c0_11, %c0_12] : memref<1x256xf32, #tpu.memory_space<vmem>>, vector<1x256xf32>
    %13 = arith.addf %12, %8 : vector<1x256xf32>
    %c0_13 = arith.constant 0 : index
    %c0_14 = arith.constant 0 : index
    %14 = vector.load %arg6[%c0_13, %c0_14] : memref<1x256xf32, #tpu.memory_space<vmem>>, vector<1x256xf32>
    tpu.vector_store %arg6[%c0_13, %c0_14], %13 {strides = array<i32>} : memref<1x256xf32, #tpu.memory_space<vmem>>, vector<1x256xf32>,
    %c0_i32_15 = arith.constant 0 : i32
    %15 = arith.cmpi eq, %arg1, %c0_i32_15 : i32
    %16 = arith.extui %15 : i1 to i32
    %c0_i32_16 = arith.constant 0 : i32
    %17 = arith.cmpi ne, %16, %c0_i32_16 : i32
    scf.if %17 {
      %c0_17 = arith.constant 0 : index
      %c0_18 = arith.constant 0 : index
      %18 = vector.load %arg5[%c0_17, %c0_18] : memref<1x256xf32, #tpu.memory_space<vmem>>, vector<1x256xf32>
      %c0_19 = arith.constant 0 : index
      %c0_20 = arith.constant 0 : index
      %19 = vector.load %arg6[%c0_19, %c0_20] : memref<1x256xf32, #tpu.memory_space<vmem>>, vector<1x256xf32>
      %20 = arith.mulf %18, %18 : vector<1x256xf32>
      %cst_21 = arith.constant dense<0.000000e+00> : vector<1xf32>
      %21 = vector.multi_reduction <add>, %20, %cst_21 [1] : vector<1x256xf32> to vector<1xf32>
      %22 = vector.shape_cast %21 : vector<1xf32> to vector<1x1xf32>
      %23 = math.sqrt %22 : vector<1x1xf32>
      %24 = arith.mulf %19, %19 : vector<1x256xf32>
      %cst_22 = arith.constant dense<0.000000e+00> : vector<1xf32>
      %25 = vector.multi_reduction <add>, %24, %cst_22 [1] : vector<1x256xf32> to vector<1xf32>
      %26 = vector.shape_cast %25 : vector<1xf32> to vector<1x1xf32>
      %27 = math.sqrt %26 : vector<1x1xf32>
      %cst_23 = arith.constant 9.99999997E-7 : f32
      %28 = vector.broadcast %cst_23 : f32 to vector<1x1xf32>
      %29 = arith.addf %23, %28 : vector<1x1xf32>
      %cst_24 = arith.constant 1.000000e+00 : f32
      %30 = vector.broadcast %cst_24 : f32 to vector<1x1xf32>
      %31 = arith.divf %30, %29 : vector<1x1xf32>
      %cst_25 = arith.constant 9.99999997E-7 : f32
      %32 = vector.broadcast %cst_25 : f32 to vector<1x1xf32>
      %33 = arith.addf %27, %32 : vector<1x1xf32>
      %cst_26 = arith.constant 1.000000e+00 : f32
      %34 = vector.broadcast %cst_26 : f32 to vector<1x1xf32>
      %35 = arith.divf %34, %33 : vector<1x1xf32>
      %36 = vector.broadcast %31 : vector<1x1xf32> to vector<1x256xf32>
      %37 = arith.mulf %18, %36 : vector<1x256xf32>
      %38 = vector.broadcast %35 : vector<1x1xf32> to vector<1x256xf32>
      %39 = arith.mulf %19, %38 : vector<1x256xf32>
      %40 = arith.subf %37, %39 : vector<1x256xf32>
      %41 = arith.mulf %40, %40 : vector<1x256xf32>
      %42 = vector.shape_cast %41 : vector<1x256xf32> to vector<1x1x256xf32>
      %cst_27 = arith.constant dense<0.000000e+00> : vector<1xf32>
      %43 = vector.multi_reduction <add>, %42, %cst_27 [1, 2] : vector<1x1x256xf32> to vector<1xf32>
      %44 = vector.shape_cast %43 : vector<1xf32> to vector<1x1x1xf32>
      %45 = vector.extract %44[0, 0, 0] : f32 from vector<1x1x1xf32>
      %46 = vector.broadcast %45 : f32 to vector<1x1x128xf32>
      %c0_28 = arith.constant 0 : index
      %c0_29 = arith.constant 0 : index
      %c0_30 = arith.constant 0 : index
      %47 = vector.load %arg4[%c0_28, %c0_29, %c0_30] : memref<1x1x128xf32, #tpu.memory_space<vmem>>, vector<1x1x128xf32>
      tpu.vector_store %arg4[%c0_28, %c0_29, %c0_30], %46 {strides = array<i32>} : memref<1x1x128xf32, #tpu.memory_space<vmem>>, vector<1x1x128xf32>,
    } else {
    }
    return
  }
  func.func @transform_0(%arg0: i32, %arg1: i32) -> (i32, i32, i32) {
    %c0_i32 = arith.constant 0 : i32
    %c0_i32_0 = arith.constant 0 : i32
    return %arg0, %arg1, %c0_i32 : i32, i32, i32
  }
  func.func @transform_1(%arg0: i32, %arg1: i32) -> (i32, i32, i32) {
    %c0_i32 = arith.constant 0 : i32
    %c0_i32_0 = arith.constant 0 : i32
    return %arg0, %arg1, %c0_i32 : i32, i32, i32
  }
  func.func @transform_2(%arg0: i32, %arg1: i32) -> (i32, i32, i32) {
    %c0_i32 = arith.constant 0 : i32
    %c0_i32_0 = arith.constant 0 : i32
    %c0_i32_1 = arith.constant 0 : i32
    return %arg0, %c0_i32, %c0_i32_0 : i32, i32, i32
  }
}

</mosaic_0001>

<bundles_post_ra>
// kernel: tpu_custom_call.1
= control target key start
LH: loop header
LB: loop body
LE: loop exit
PB: predicated region body
PF: predicated region fallthrough
CT: control target
= control target key end

     0   :  { %7 = vsyncpa [#allocation5], 0  ;;  %s1033_s0 = inlined_call_operand.hbm [shape: f32[2,4,256], index: 0, kind: input, shape index: {}]   ;;  %s1034_s1 = inlined_call_operand.hbm [shape: f32[2,4,256], index: 1, kind: input, shape index: {}]   ;;  %s1035_s2 = inlined_call_operand.hbm [shape: f32[2,1,128], index: 2, kind: output, shape index: {}]  }
   0x1   :  { %9 = vsyncpa [#allocation5 + $0x1], 0 }
   0x2   :  { %10 = vsyncpa [#allocation8], 0 }
   0x3   :  { %12 = vsyncpa [#allocation8 + $0x1], 0 }
   0x4   :  { %13 = vsyncpa [#allocation6], 0 }
   0x5   :  { %15 = vsyncpa [#allocation6 + $0x1], 0  ;;  %s794_s9 = smov 0   ;;  %s796_s10 = smov 0  }
   0x6   :  { %s798_s11 = smov 0   ;;  %s800_s12 = smov 0  }
   0x7   :  { %s802_s13 = smov 0   ;;  %s804_s14 = smov 0  }
   0x8 LB: > { %s529_s15 = sadd.s32 4294967295, %s772_s14   ;;  %s530_s16 = sadd.s32 4294967294, %s772_s14   ;;  %s772_s14 = sphi %s804_s14, %s21_s14   ;;  %s768_s13 = sphi %s802_s13, %s1057_s13   ;;  %s764_s12 = sphi %s800_s12, %s1056_s12   ;;  %s760_s11 = sphi %s798_s11, %s1055_s11   ;;  %s756_s10 = sphi %s796_s10, %s1054_s10   ;;  %s752_s9 = sphi %s794_s9, %s1053_s9  }
   0x9   : > { %s33_s17 = sadd.s32 1, %s768_s13  ;;  %s42_s18 = sadd.s32 1, %s760_s11 }
   0xa   : > { %p35_p0 = scmp.ge.s32.totalorder %s33_s17, 2  ;;  %p49_p1 = scmp.ne.s32.totalorder %s760_s11, %s756_s10 }
   0xb   : > { %p50_p2 = scmp.eq.s32.totalorder %s772_s14, 0  ;;  %p55_p3 = scmp.ne.s32.totalorder %s756_s10, %s752_s9 }
   0xc   : > { %s1059_s17 = smov (%p35_p0, %s33_s17), 0  ;;  %p56_p5 = scmp.eq.s32.totalorder %s529_s15, 0 }
   0xd   : > { %p835_p4 = por %p50_p2, %p49_p1  ;;  %s37_s20 = ssub.s32 %s768_s13, %s1059_s17 }
   0xe   : > { %p107_p6 = scmp.eq.s32.totalorder %s529_s15, 1  ;;  %p40_p7 = scmp.eq.s32.totalorder %s37_s20, 0 }
   0xf   : > { %p841_p8 = por %p56_p5, %p55_p3  ;;  %p113_p10 = scmp.eq.s32.totalorder %s530_s16, 1 }
  0x10   : > { %p845_p9 = por %p107_p6, %p49_p1  ;;  %p566_p13 = scmp.lt.s32.totalorder %s772_s14, 2 }
  0x11   : > { %s1039_s21 = scalar_select %p841_p8, 1, 0 }
  0x12   : > { %s1040_s22 = scalar_select %p845_p9, 1, 0 }
  0x13   : > { %s850_s23 = scalar_select %p40_p7, %s760_s11, %s42_s18  }
  0x14   : > { %p852_p11 = por %p113_p10, %p55_p3  ;;  %s859_s25 = sand.u32 1, %s760_s11  }
  0x15   : > { %s533_s26 = sshll.u32 %s859_s25, 3  ;;  %s545_s27 = sshll.u32 %s768_s13, 7 }
  0x16   : > { %s1041_s24 = scalar_select %p852_p11, 1, 0 }
  0x17   : > { %s868_s30 = scalar_lea.hbm %s1033_s0, %s545_s27  ;;  %s137_s3 = scalar_lea.vmem [#allocation4], %s533_s26 }
  0x18   : > { %s147_s4 = sshll.u32 %s137_s3, 4  ;;  %p876_p0 = pnand %p566_p13, %p835_p4  ;;  %s872_s4 = int_to_ptr.vmem [resolvable:$true] %s147_s4 }
  0x19   : > { %s134_s6 = scalar_lea.sflag [#allocation5], %s859_s25  ;;  %s626_s7 = scalar_lea.hbm %s868_s30, 128 }
  0x1a   : > { %p627_p3 = scmp.ne.s32.totalorder %s868_s30, %s626_s7  ;;  %p628_p5 = pneg %p876_p0 }
  0x1b   : > { %s631_s16 = scalar_lea.hbm %s1033_s0, 256  ;;  %p632_p4 = scmp.lt.u32.totalorder %s868_s30, %s1033_s0 }
  0x1c   : > { %p629_p6 = pnand %p628_p5, %p627_p3  ;;  %p633_p10 = scmp.lt.u32.totalorder %s631_s16, %s626_s7 }
  0x1d   : > { %p635_p12 = scmp.lt.u32.totalorder %s626_s7, %s868_s30 }
  0x1e   : > { %p630_p7 = pneg %p629_p6  ;;  %p634_p13 = por %p633_p10, %p632_p4 }
  0x20   : > { %p636_p1 = por %p635_p12, %p634_p13 }
  0x22   : > { %p637_p2 = pnand %p636_p1, %p630_p7 }
  0x24   : > { %640 = shalt.err (!%p637_p2)
}
  0x25   : > { %s641_s20 = scalar_lea.vmem %s872_s4, 128  ;;  %s774_s28 = smov [#allocation4]  }
  0x26   : > { %p642_p3 = scmp.ne.s32.totalorder %s872_s4, %s641_s20  ;;  %s646_s29 = sshll.u32 %s774_s28, 4  ;;  %s647_s29 = int_to_ptr.vmem [resolvable:$false] %s646_s29 }
  0x27   : > { %s648_s3 = scalar_lea.vmem %s647_s29, 256  ;;  %p649_p9 = scmp.lt.s32.totalorder %s872_s4, %s647_s29 }
  0x28   : > { %p644_p6 = pnand %p642_p3, %p628_p5  ;;  %p650_p4 = scmp.lt.s32.totalorder %s648_s3, %s641_s20 }
  0x2a   : > { %p645_p11 = pneg %p644_p6  ;;  %p651_p10 = por %p650_p4, %p649_p9 }
  0x2c   : > { %p652_p12 = pnand %p651_p10, %p645_p11 }
  0x2e   : > { %655 = shalt.err (!%p652_p12)
}
  0x2f   : > { %558 = dma.hbm_to_vmem [thread:$0]  (!%p876_p0), %s868_s30, 128, %s872_s4, %s134_s6  }
  0x30   : > { %p1043_p1 = scmp.lt.s32.totalorder %s772_s14, 3  ;;  %p1044_p2 = scmp.ge.s32.totalorder %s772_s14, 1 }
  0x31   : > { %s921_s16 = scalar_lea.hbm %s1034_s1, %s545_s27  ;;  %s158_s18 = scalar_lea.vmem [#allocation7], %s533_s26 }
  0x32   : > { %p912_p7 = pnand %p1044_p2, %p1043_p1  ;;  %s168_s19 = sshll.u32 %s158_s18, 4  ;;  %s169_s19 = int_to_ptr.vmem [resolvable:$true] %s168_s19 }
  0x33   : > { %s155_s30 = scalar_lea.sflag [#allocation8], %s859_s25  ;;  %s656_s4 = scalar_lea.hbm %s921_s16, 128 }
  0x34   : > { %s1045_s7 = scalar_select %p912_p7, 1, 0 }
  0x35   : > { %p657_p9 = scmp.ne.s32.totalorder %s921_s16, %s656_s4  ;;  %s661_s27 = scalar_lea.hbm %s1034_s1, 256 }
  0x36   : > { %p662_p3 = scmp.lt.u32.totalorder %s921_s16, %s1034_s1  ;;  %p663_p6 = scmp.lt.u32.totalorder %s661_s27, %s656_s4 }
  0x37   : > { %p659_p11 = pnand %p657_p9, %p628_p5  ;;  %p665_p10 = scmp.lt.u32.totalorder %s656_s4, %s921_s16 }
  0x38   : > { %p664_p4 = por %p663_p6, %p662_p3 }
  0x39   : > { %p660_p13 = pneg %p659_p11 }
  0x3a   : > { %p666_p12 = por %p665_p10, %p664_p4 }
  0x3c   : > { %p667_p1 = pnand %p666_p12, %p660_p13 }
  0x3e   : > { %670 = shalt.err (!%p667_p1)
}
  0x3f   : > { %s671_s25 = scalar_lea.vmem %s169_s19, 128  ;;  %s775_s26 = smov [#allocation7]  }
  0x40   : > { %p672_p2 = scmp.ne.s32.totalorder %s169_s19, %s671_s25  ;;  %s676_s3 = sshll.u32 %s775_s26, 4  ;;  %s677_s3 = int_to_ptr.vmem [resolvable:$false] %s676_s3 }
  0x41   : > { %s678_s8 = scalar_lea.vmem %s677_s3, 256  ;;  %p679_p8 = scmp.lt.s32.totalorder %s169_s19, %s677_s3 }
  0x42   : > { %p674_p9 = pnand %p672_p2, %p628_p5  ;;  %p680_p7 = scmp.lt.s32.totalorder %s678_s8, %s671_s25 }
  0x44   : > { %p675_p11 = pneg %p674_p9  ;;  %p681_p3 = por %p680_p7, %p679_p8 }
  0x46   : > { %p682_p6 = pnand %p681_p3, %p675_p11 }
  0x48   : > { %685 = shalt.err (!%p682_p6)
}
  0x49   : > { %561 = dma.hbm_to_vmem [thread:$0]  (!%p876_p0), %s921_s16, 128, %s169_s19, %s155_s30  }
  0x4a   : > { %p1046_p13 = scmp.ne.s32.totalorder %s1045_s7, 0 }
  0x4b   : > { %s948_s15 = sand.u32 (!%p1046_p13), 1, %s756_s10   ;;  %p1047_p5 = scmp.ne.s32.totalorder (!%p1046_p13), %s1039_s21, 0 }
  0x4c   : > { %177 = sbr.rel (%p1046_p13) target bundleno = 533 (0x215), region = 28  ;;  %s540_s18 = sshll.u32 (!%p1046_p13), %s948_s15, 3 }
  0x4d   : > { %s180_s4 = scalar_lea.sflag (!%p1046_p13), [#allocation5], %s948_s15  ;;  %s183_s6 = scalar_lea.vmem (!%p1046_p13), [#allocation4], %s540_s18 }
  0x53   : > { %739 = dma.done.wait (%p1047_p5), %s180_s4, 128  }
  0x54   : > { %741 = vsyncadd (%p1047_p5), %s180_s4, 4294967168  ;;  %s189_s5 = scalar_lea.sflag [#allocation8], %s948_s15  ;;  %s192_s16 = scalar_lea.vmem [#allocation7], %s540_s18 }
  0x55   : > { %743 = dma.done.wait (%p1047_p5), %s189_s5, 128  }
  0x56   : > { %745 = vsyncadd (%p1047_p5), %s189_s5, 4294967168  ;;  %v221_v0 = vlaneseq  ;;  %v776_v2 = vmov 0.0   ;;  %v227_v3 = vld [vmem:[%s183_s6] sm:$0xff]  ;;  %v228_v4 = vld [vmem:[%s192_s16] sm:$0xff]  ;;  %vm234_vm1 = vcmask 1043456   ;;  %vm329_vm2 = vcmask 1040384  }
  0x57   : > { %v229_v5 = vmul.f32 %v227_v3, %v227_v3  ;;  %v230_v6 = vmul.f32 %v228_v4, %v228_v4  ;;  %v777_v19 = vmov 1966171168   ;;  %s216_s21 = scalar_lea.vmem [#allocation9], %s948_s15  ;;  %s542_s19 = sshll.u32 %s764_s12, 4 }
  0x58   : > { %vm961_vm0 = vcmp.lt.s32.totalorder %v221_v0, 256  ;;  %v271_v20 = vunpack.c.l.s4 %v777_v19  ;;  %v274_v30 = vshrl.u32 %v221_v0, 7  ;;  %s426_s7 = sshll.u32 %s216_s21, 4  ;;  %s986_s28 = scalar_lea.hbm %s1035_s2, %s542_s19  ;;  %s981_s7 = int_to_ptr.vmem [resolvable:$true] %s426_s7 }
  0x59   : > { %225 = vst.msk [vmem:[#allocation2] sm:$0x3] %vm961_vm0, %v776_v2  ;;  %226 = vst.msk [vmem:[#allocation3] sm:$0x3] %vm961_vm0, %v776_v2  ;;  %v232_v7 = vcombine.high %v229_v5, %v229_v5  ;;  %v235_v8 = vsel %vm234_vm1, %v229_v5, 0.0  ;;  %v250_v9 = vcombine.high %v230_v6, %v230_v6  ;;  %v252_v10 = vsel %vm234_vm1, %v230_v6, 0.0 }
  0x5a   : > { %v236_v11 = vrot.slane %v235_v8, 4  ;;  %v253_v12 = vrot.slane %v252_v10, 4  ;;  %v272_v29 = vunpack.c.0.s8 %v271_v20  ;;  %v321_v52 = vsub.s32 0, %v274_v30  ;;  %s414_s29 = scalar_lea.sflag [#allocation6], %s948_s15  ;;  %s686_s25 = scalar_lea.vmem %s981_s7, 16 }
  0x5b   : > { %v242_v13 = vsel %vm234_vm1, %v232_v7, 0.0  ;;  %v259_v14 = vsel %vm234_vm1, %v250_v9, 0.0  ;;  %v325_v53 = vsub.s32 1, %v274_v30  ;;  %p687_p8 = scmp.ne.s32.totalorder %s981_s7, %s686_s25  ;;  %p1050_p0 = scmp.ne.s32.totalorder %s1040_s22, 0 }
  0x5c   : > { %v237_v15 = vadd.f32 %v236_v11, %v235_v8  ;;  %v243_v16 = vrot.slane %v242_v13, 4  ;;  %v254_v17 = vadd.f32 %v253_v12, %v252_v10  ;;  %v260_v18 = vrot.slane %v259_v14, 4  ;;  %s778_s12 = smov [#allocation9]  }
  0x5d   : > { %v275_v41 = vsub.s32 %v272_v29, %v274_v30  ;;  %p688_p7 = pnand %p687_p8, %p1050_p0  ;;  %s690_s26 = sshll.u32 %s778_s12, 4  ;;  %s691_s26 = int_to_ptr.vmem [resolvable:$false] %s690_s26 }
  0x5e   : > { %v238_v21 = vrot.slane %v237_v15, 2  ;;  %v244_v22 = vadd.f32 %v243_v16, %v242_v13  ;;  %v255_v23 = vrot.slane %v254_v17, 2  ;;  %v261_v24 = vadd.f32 %v260_v18, %v259_v14  ;;  %s692_s3 = scalar_lea.vmem %s691_s26, 32  ;;  %p693_p10 = scmp.lt.s32.totalorder %s981_s7, %s691_s26 }
  0x5f   : > { %p689_p4 = pneg %p688_p7  ;;  %p694_p12 = scmp.lt.s32.totalorder %s692_s3, %s686_s25 }
  0x60   : > { %v239_v25 = vadd.f32 %v238_v21, %v237_v15  ;;  %v245_v26 = vrot.slane %v244_v22, 2  ;;  %v256_v27 = vadd.f32 %v255_v23, %v254_v17  ;;  %v262_v28 = vrot.slane %v261_v24, 2  ;;  %v266_v46 = vld [vmem:[#allocation2] sm:$0x3]  ;;  %v291_v47 = vld [vmem:[#allocation3] sm:$0x3] }
  0x61   : > { %p695_p1 = por %p694_p12, %p693_p10 }
  0x62   : > { %v240_v31 = vrot.slane %v239_v25, 1  ;;  %v246_v32 = vadd.f32 %v245_v26, %v244_v22  ;;  %v257_v33 = vrot.slane %v256_v27, 1  ;;  %v263_v34 = vadd.f32 %v262_v28, %v261_v24 }
  0x63   : > { %p696_p2 = pnand %p695_p1, %p689_p4 }
  0x64   : > { %v241_v35 = vadd.f32 %v240_v31, %v239_v25  ;;  %v247_v36 = vrot.slane %v246_v32, 1  ;;  %v258_v37 = vadd.f32 %v257_v33, %v256_v27  ;;  %v264_v38 = vrot.slane %v263_v34, 1 }
  0x66   : > { %v248_v39 = vadd.f32 %v247_v36, %v246_v32  ;;  %v265_v40 = vadd.f32 %v264_v38, %v263_v34 }
  0x68   : > { %v269_v42 = vcombine.low %v241_v35, %v248_v39  ;;  %v294_v43 = vcombine.low %v258_v37, %v265_v40 }
  0x6a   : > { %v276_v44 = vrot.slane %v269_v42, %v275_v41  ;;  %v301_v45 = vrot.slane %v294_v43, %v275_v41 }
  0x6c   : > { %v283_v48 = vrot.slane %v276_v44, %v275_v41  ;;  %v308_v49 = vrot.slane %v301_v45, %v275_v41 }
  0x6e   : > { %v285_v50 = vadd.f32 %v283_v48, %v266_v46  ;;  %v310_v51 = vadd.f32 %v308_v49, %v291_v47 }
  0x70   : > { %290 = vst.msk [vmem:[#allocation2] sm:$0x3] %vm961_vm0, %v285_v50  ;;  %311 = vst.msk [vmem:[#allocation3] sm:$0x3] %vm961_vm0, %v310_v51 }
  0x77   : > { %v315_v54 = vld [vmem:[#allocation2] sm:$0x3]  ;;  %v316_v55 = vld [vmem:[#allocation3] sm:$0x3] }
  0x78   : > { %v317_v56 = vmul.f32 %v315_v54, %v315_v54  ;;  %v342_v57 = vmul.f32 %v316_v55, %v316_v55 }
  0x7a   : > { %v322_v58 = vrot.slane %v317_v56, %v321_v52  ;;  %v326_v59 = vrot.slane %v317_v56, %v325_v53  ;;  %v347_v60 = vrot.slane %v342_v57, %v321_v52  ;;  %v351_v61 = vrot.slane %v342_v57, %v325_v53 }
  0x7c   : > { %v330_v62 = vsel %vm329_vm2, %v322_v58, 0.0  ;;  %v331_v63 = vsel %vm329_vm2, %v326_v59, 0.0  ;;  %v354_v0 = vsel %vm329_vm2, %v347_v60, 0.0  ;;  %v355_v1 = vsel %vm329_vm2, %v351_v61, 0.0 }
  0x7d   : > { %v332_v2 = vadd.f32 %v331_v63, %v330_v62  ;;  %v356_v3 = vadd.f32 %v355_v1, %v354_v0 }
  0x7f   : > { %333 = vadd.xlane.f32.xlu0 %v332_v2 }
  0x83   : > { %357 = vadd.xlane.f32.xlu0 %v356_v3 }
 0x10c   : > { %v334_v4 = vpop.xlane.xlu0 %333 }
 0x10d   : > { %618 = vrsqrt.f32 %v334_v4  ;;  %vm337_vm3 = vcmp.eq.f32.partialorder %v334_v4, inf  ;;  %v340_v8 = vand.u32 2147483648, %v334_v4  ;;  %vm339_vm4 = vcmp.eq.f32.partialorder %v334_v4, 0.0 }
 0x110   : > { %v358_v5 = vpop.xlane.xlu0 %357 }
 0x111   : > { %620 = vrsqrt.f32 %v358_v5  ;;  %vm361_vm5 = vcmp.eq.f32.partialorder %v358_v5, inf  ;;  %v364_v14 = vand.u32 2147483648, %v358_v5  ;;  %vm363_vm6 = vcmp.eq.f32.partialorder %v358_v5, 0.0 }
 0x117   : > { %v619_v6 = vpop.eup %618 }
 0x118   : > { %v336_v7 = vmul.f32 %v619_v6, %v334_v4 }
 0x11a   : > { %v338_v9 = vsel %vm337_vm3, %v334_v4, %v336_v7 }
 0x11b   : > { %v621_v10 = vpop.eup %620  ;;  %v341_v11 = vsel %vm339_vm4, %v340_v8, %v338_v9 }
 0x11c   : > { %v366_v12 = vadd.f32 1e-06, %v341_v11  ;;  %v360_v13 = vmul.f32 %v621_v10, %v358_v5 }
 0x11e   : > { %622 = vrcp.f32 %v366_v12  ;;  %v362_v15 = vsel %vm361_vm5, %v358_v5, %v360_v13 }
 0x11f   : > { %v365_v16 = vsel %vm363_vm6, %v364_v14, %v362_v15 }
 0x120   : > { %v369_v17 = vadd.f32 1e-06, %v365_v16 }
 0x122   : > { %624 = vrcp.f32 %v369_v17 }
 0x128   : > { %v623_v18 = vpop.eup %622 }
 0x129   : > { %v376_v19 = vrot.slane %v623_v18, %v321_v52 }
 0x12b   : > { %v378_v22 = vmul.f32 %v376_v19, %v315_v54 }
 0x12c   : > { %v625_v20 = vpop.eup %624 }
 0x12d   : > { %v383_v21 = vrot.slane %v625_v20, %v321_v52 }
 0x12f   : > { %v385_v23 = vmul.f32 %v383_v21, %v316_v55 }
 0x131   : > { %v386_v24 = vsub.f32 %v378_v22, %v385_v23 }
 0x133   : > { %v387_v25 = vmul.f32 %v386_v24, %v386_v24 }
 0x135   : > { %v392_v26 = vrot.slane %v387_v25, %v321_v52  ;;  %v396_v27 = vrot.slane %v387_v25, %v325_v53 }
 0x137   : > { %v399_v28 = vsel %vm329_vm2, %v392_v26, 0.0  ;;  %v400_v29 = vsel %vm329_vm2, %v396_v27, 0.0 }
 0x138   : > { %v401_v30 = vadd.f32 %v400_v29, %v399_v28 }
 0x13a   : > { %402 = vadd.xlane.f32.xlu1 %v401_v30 }
 0x1c7   : > { %v403_v31 = vpop.xlane.xlu1 %402 }
 0x1c8   : > { %v404_v32 = vrot.slane %v403_v31, 4 }
 0x1ca   : > { %v405_v33 = vadd.f32 %v404_v32, %v403_v31 }
 0x1cc   : > { %v406_v34 = vrot.slane %v405_v33, 2 }
 0x1ce   : > { %v407_v35 = vadd.f32 %v406_v34, %v405_v33 }
 0x1d0   : > { %v408_v36 = vrot.slane %v407_v35, 1 }
 0x1d2   : > { %v409_v37 = vadd.f32 %v408_v36, %v407_v35 }
 0x1d4   : > { %547 = vpush %v409_v37 }
 0x205   : > { %s548_s30 = spop %547 }
 0x206   : > { %v411_v38 = vstv %s548_s30 }
 0x207   : > { %412 = vst [vmem:[%s216_s21] sm:$0x1] %v411_v38 }
 0x208   : > { %699 = shalt.err (!%p696_p2)
}
 0x209   : > { %s700_s8 = scalar_lea.hbm %s986_s28, 16  ;;  %s704_s4 = scalar_lea.hbm %s1035_s2, 32 }
 0x20a   : > { %p701_p9 = scmp.ne.s32.totalorder %s986_s28, %s700_s8  ;;  %p705_p6 = scmp.lt.u32.totalorder %s986_s28, %s1035_s2 }
 0x20b   : > { %p706_p13 = scmp.lt.u32.totalorder %s704_s4, %s700_s8  ;;  %p708_p8 = scmp.lt.u32.totalorder %s700_s8, %s986_s28 }
 0x20c   : > { %p702_p11 = pnand %p701_p9, %p1050_p0 }
 0x20d   : > { %p707_p5 = por %p706_p13, %p705_p6 }
 0x20e   : > { %p703_p3 = pneg %p702_p11 }
 0x20f   : > { %p709_p7 = por %p708_p8, %p707_p5 }
 0x211   : > { %p710_p4 = pnand %p709_p7, %p703_p3 }
 0x213   : > { %713 = shalt.err (!%p710_p4)
}
 0x214   : > { %553 = dma.vmem_to_hbm [thread:$0]  (%p1050_p0), %s981_s7, 16, %s986_s28, %s414_s29  }
 0x215 PF: > { %s438_s16 = sand.u32 1, %s752_s9   ;;  %p1051_p10 = scmp.ne.s32.totalorder %s1041_s24, 0 }
 0x216   : > { %p1052_p12 = scmp.ge.s32.totalorder %s772_s14, 2  ;;  %s439_s21 = scalar_lea.sflag [#allocation6], %s438_s16 }
 0x218   : > { %p563_p1 = pnand %p1052_p12, %p1051_p10 }
 0x21a   : > { %747 = dma.done.wait (!%p563_p1), %s439_s21, 16  }
 0x21b   : > { %749 = vsyncadd (!%p563_p1), %s439_s21, 4294967280  ;;  %s21_s14 = sadd.s32 1, %s772_s14   ;;  %s1053_s9 = smov %s756_s10 }
 0x21c   : > { %p18_p2 = scmp.ge.s32.totalorder %s21_s14, 4   ;;  %s1054_s10 = smov %s760_s11 }
 0x21d   : > { %s1055_s11 = smov %s850_s23  ;;  %s1056_s12 = smov %s768_s13 }
 0x21e   : > { %s1057_s13 = smov %s1059_s17  ;;  %20 = sbr.rel (!%p18_p2) target bundleno = 8 (0x8), region = 94 }
 0x225   :  { %443 = vsyncpa [#allocation5], 1 }
 0x226   :  { %445 = vsyncpa [#allocation5 + $0x1], 1 }
 0x227   :  { %446 = vsyncpa [#allocation8], 1 }
 0x228   :  { %448 = vsyncpa [#allocation8 + $0x1], 1 }
 0x229   :  { %449 = vsyncpa [#allocation6], 1 }
 0x22a   :  { %451 = vsyncpa [#allocation6 + $0x1], 1 }

</bundles_post_ra>
